<compile_context>
chip_gen: v7x
topology: tpu7x:2x2x1
jax: 0.10.0
libtpu: 0.0.40
codegen_flags: <defaults>
</compile_context>

<pallas_src>
import jax
import jax.numpy as jnp
from jax.experimental import pallas as pl
from jax.experimental.pallas import tpu as pltpu


def with_sigmoid_kernel(x_ref, wt_ref, b_ref, o_ref):
    # x_ref: (C_in, T)  wt_ref: (C_out, C_in)  b_ref: (C_out, 1)  o_ref: (C_out, T)
    # wt_ref / b_ref already carry the *50 fold.
    x = x_ref[...]
    wt = wt_ref[...]
    c_in = x.shape[0]

    # Seed the accumulator with bias + first FMA (no separate bias-broadcast
    # pass), then unrolled exact-f32 broadcast-FMAs over the tiny contraction.
    acc = b_ref[...] + wt[:, 0:1] * x[0:1, :]
    for c in range(1, c_in):
        acc = acc + wt[:, c:c + 1] * x[c:c + 1, :]

    # sigmoid(z) == 0.5*tanh(z/2) + 0.5 : single EUP transcendental, no divide
    # on the VALU.  (acc is already 50*y because the fold happened in wt/b.)
    o_ref[...] = 0.5 * jnp.tanh(0.5 * acc) + 0.5


def _pick_hw_tile(hw_pad, n, max_lanes=65536):
    """Largest multiple-of-128 lane tile dividing hw_pad, <= max_lanes, and such
    that the total grid has >=2 programs when possible (v7x megacore)."""
    t = min(hw_pad, max_lanes)
    t -= t % 128
    t = max(t, 128)
    while hw_pad % t != 0:
        t -= 128
    # Guarantee >= 2 grid programs so v7x can shard across both TensorCores.
    if n * (hw_pad // t) < 2 and hw_pad >= 256:
        t2 = (hw_pad // 2) - ((hw_pad // 2) % 128)
        t2 = max(t2, 128)
        while hw_pad % t2 != 0:
            t2 -= 128
        t = t2
    return t


def with_sigmoid(x_nchw, w, b):
    """sigmoid(50 * conv1x1(x)).  x_nchw: (N,C_in,H,W) f32; w: (C_in,C_out); b: (C_out,)."""
    N, C_in, H, W = x_nchw.shape
    C_out = w.shape[1]
    HW = H * W

    # Fold the *50 into the (tiny) weight/bias -- free in the wrapper.
    wt = jnp.transpose(w) * 50.0           # (C_out, C_in), VMEM-resident
    b2 = (b * 50.0).reshape(C_out, 1)

    x3 = x_nchw.reshape(N, C_in, HW)       # free reshape, stays in NCHW order

    # Pad HW to a multiple of 128 so the output stays unmasked lane-dense and
    # the tile cap always applies (no uncapped full-extent fallback).
    HW_pad = ((HW + 127) // 128) * 128
    if HW_pad != HW:
        x3 = jnp.pad(x3, ((0, 0), (0, 0), (0, HW_pad - HW)))

    T = _pick_hw_tile(HW_pad, N)
    grid = (N, HW_pad // T)

    out3 = pl.pallas_call(
        with_sigmoid_kernel,
        out_shape=jax.ShapeDtypeStruct((N, C_out, HW_pad), jnp.float32),
        grid_spec=pl.GridSpec(
            grid=grid,
            in_specs=[
                # batch dim squeezed; lane axis carries the spatial tile.
                pl.BlockSpec((None, C_in, T), lambda n, j: (n, 0, j)),
                pl.BlockSpec((C_out, C_in), lambda n, j: (0, 0)),  # resident weight
                pl.BlockSpec((C_out, 1), lambda n, j: (0, 0)),     # resident bias
            ],
            out_specs=pl.BlockSpec((None, C_out, T), lambda n, j: (n, 0, j)),
        ),
        compiler_params=pltpu.CompilerParams(
            dimension_semantics=("parallel", "parallel"),
            vmem_limit_bytes=40 * 1024 * 1024,
        ),
    )(x3, wt, b2)

    if HW_pad != HW:
        out3 = out3[:, :, :HW]
    return out3.reshape(N, C_out, H, W)    # already NCHW; free reshape


if __name__ == "__main__":
    key = jax.random.PRNGKey(0)
    kx, kw, kb = jax.random.split(key, 3)

    N, C_in, H, W = 2, 4, 16, 16
    C_out = 8

    x = jax.random.normal(kx, (N, C_in, H, W), dtype=jnp.float32)
    w = jax.random.normal(kw, (C_in, C_out), dtype=jnp.float32) * 0.1
    b = jax.random.normal(kb, (C_out,), dtype=jnp.float32) * 0.1

    out = jax.block_until_ready(with_sigmoid(x, w, b))

    # Pure-JAX reference (HIGHEST precision, exact wrapper semantics sigmoid(50*y)).
    y = jnp.einsum("io,nihw->nohw", w, x,
                   precision=jax.lax.Precision.HIGHEST) + b.reshape(1, C_out, 1, 1)
    ref = jax.nn.sigmoid(50.0 * y)

    assert out.shape == (N, C_out, H, W)
    assert jnp.allclose(out, ref, atol=1e-5, rtol=1e-5)
    print("KERNEL_OK")
</pallas_src>

<mosaic_0001>
module attributes {stable_mosaic.version = 11 : i64} {
  func.func @with_sigmoid_kernel(%arg0: i32, %arg1: i32, %arg2: memref<1x4x256xf32, #tpu.memory_space<vmem>>, %arg3: memref<8x4xf32, #tpu.memory_space<vmem>>, %arg4: memref<8x1xf32, #tpu.memory_space<vmem>>, %arg5: memref<1x8x256xf32, #tpu.memory_space<vmem>>) attributes {dimension_semantics = [#tpu.dimension_semantics<parallel>, #tpu.dimension_semantics<parallel>], iteration_bounds = array<i64: 2, 1>, scalar_prefetch = 0 : i64, scratch_operands = 0 : i64, tpu.core_type = #tpu.core_type<tc>, window_params = [{transform_indices = @transform_0, window_bounds = array<i64: 1, 4, 256>}, {pipeline_mode = #tpu.pipeline_mode<synchronous>, transform_indices = @transform_1, window_bounds = array<i64: 8, 4>}, {pipeline_mode = #tpu.pipeline_mode<synchronous>, transform_indices = @transform_2, window_bounds = array<i64: 8, 1>}, {transform_indices = @transform_3, window_bounds = array<i64: 1, 8, 256>}]} {
    %c0 = arith.constant 0 : index
    %c0_0 = arith.constant 0 : index
    %c0_1 = arith.constant 0 : index
    %0 = vector.load %arg2[%c0, %c0_0, %c0_1] : memref<1x4x256xf32, #tpu.memory_space<vmem>>, vector<1x4x256xf32>
    %1 = vector.shape_cast %0 : vector<1x4x256xf32> to vector<4x256xf32>
    %c0_2 = arith.constant 0 : index
    %c0_3 = arith.constant 0 : index
    %2 = vector.load %arg3[%c0_2, %c0_3] : memref<8x4xf32, #tpu.memory_space<vmem>>, vector<8x4xf32>
    %c0_4 = arith.constant 0 : index
    %c0_5 = arith.constant 0 : index
    %3 = vector.load %arg4[%c0_4, %c0_5] : memref<8x1xf32, #tpu.memory_space<vmem>>, vector<8x1xf32>
    %4 = vector.extract_strided_slice %2 {offsets = [0, 0], sizes = [8, 1], strides = [1, 1]} : vector<8x4xf32> to vector<8x1xf32>
    %5 = vector.extract_strided_slice %1 {offsets = [0, 0], sizes = [1, 256], strides = [1, 1]} : vector<4x256xf32> to vector<1x256xf32>
    %6 = vector.broadcast %4 : vector<8x1xf32> to vector<8x256xf32>
    %7 = vector.broadcast %5 : vector<1x256xf32> to vector<8x256xf32>
    %8 = arith.mulf %6, %7 : vector<8x256xf32>
    %9 = vector.broadcast %3 : vector<8x1xf32> to vector<8x256xf32>
    %10 = arith.addf %9, %8 : vector<8x256xf32>
    %11 = vector.extract_strided_slice %2 {offsets = [0, 1], sizes = [8, 1], strides = [1, 1]} : vector<8x4xf32> to vector<8x1xf32>
    %12 = vector.extract_strided_slice %1 {offsets = [1, 0], sizes = [1, 256], strides = [1, 1]} : vector<4x256xf32> to vector<1x256xf32>
    %13 = vector.broadcast %11 : vector<8x1xf32> to vector<8x256xf32>
    %14 = vector.broadcast %12 : vector<1x256xf32> to vector<8x256xf32>
    %15 = arith.mulf %13, %14 : vector<8x256xf32>
    %16 = arith.addf %10, %15 : vector<8x256xf32>
    %17 = vector.extract_strided_slice %2 {offsets = [0, 2], sizes = [8, 1], strides = [1, 1]} : vector<8x4xf32> to vector<8x1xf32>
    %18 = vector.extract_strided_slice %1 {offsets = [2, 0], sizes = [1, 256], strides = [1, 1]} : vector<4x256xf32> to vector<1x256xf32>
    %19 = vector.broadcast %17 : vector<8x1xf32> to vector<8x256xf32>
    %20 = vector.broadcast %18 : vector<1x256xf32> to vector<8x256xf32>
    %21 = arith.mulf %19, %20 : vector<8x256xf32>
    %22 = arith.addf %16, %21 : vector<8x256xf32>
    %23 = vector.extract_strided_slice %2 {offsets = [0, 3], sizes = [8, 1], strides = [1, 1]} : vector<8x4xf32> to vector<8x1xf32>
    %24 = vector.extract_strided_slice %1 {offsets = [3, 0], sizes = [1, 256], strides = [1, 1]} : vector<4x256xf32> to vector<1x256xf32>
    %25 = vector.broadcast %23 : vector<8x1xf32> to vector<8x256xf32>
    %26 = vector.broadcast %24 : vector<1x256xf32> to vector<8x256xf32>
    %27 = arith.mulf %25, %26 : vector<8x256xf32>
    %28 = arith.addf %22, %27 : vector<8x256xf32>
    %cst = arith.constant 5.000000e-01 : f32
    %29 = vector.broadcast %cst : f32 to vector<8x256xf32>
    %30 = arith.mulf %29, %28 : vector<8x256xf32>
    %31 = math.tanh %30 : vector<8x256xf32>
    %cst_6 = arith.constant 5.000000e-01 : f32
    %32 = vector.broadcast %cst_6 : f32 to vector<8x256xf32>
    %33 = arith.mulf %32, %31 : vector<8x256xf32>
    %cst_7 = arith.constant 5.000000e-01 : f32
    %34 = vector.broadcast %cst_7 : f32 to vector<8x256xf32>
    %35 = arith.addf %33, %34 : vector<8x256xf32>
    %c0_8 = arith.constant 0 : index
    %c0_9 = arith.constant 0 : index
    %c0_10 = arith.constant 0 : index
    %36 = vector.load %arg5[%c0_8, %c0_9, %c0_10] : memref<1x8x256xf32, #tpu.memory_space<vmem>>, vector<1x8x256xf32>
    %37 = vector.shape_cast %36 : vector<1x8x256xf32> to vector<8x256xf32>
    %38 = vector.shape_cast %35 : vector<8x256xf32> to vector<1x8x256xf32>
    tpu.vector_store %arg5[%c0_8, %c0_9, %c0_10], %38 {strides = array<i32>} : memref<1x8x256xf32, #tpu.memory_space<vmem>>, vector<1x8x256xf32>,
    return
  }
  func.func @transform_0(%arg0: i32, %arg1: i32) -> (i32, i32, i32) {
    %c0_i32 = arith.constant 0 : i32
    %c0_i32_0 = arith.constant 0 : i32
    return %arg0, %c0_i32, %arg1 : i32, i32, i32
  }
  func.func @transform_1(%arg0: i32, %arg1: i32) -> (i32, i32) {
    %c0_i32 = arith.constant 0 : i32
    %c0_i32_0 = arith.constant 0 : i32
    %c0_i32_1 = arith.constant 0 : i32
    return %c0_i32, %c0_i32_0 : i32, i32
  }
  func.func @transform_2(%arg0: i32, %arg1: i32) -> (i32, i32) {
    %c0_i32 = arith.constant 0 : i32
    %c0_i32_0 = arith.constant 0 : i32
    %c0_i32_1 = arith.constant 0 : i32
    return %c0_i32, %c0_i32_0 : i32, i32
  }
  func.func @transform_3(%arg0: i32, %arg1: i32) -> (i32, i32, i32) {
    %c0_i32 = arith.constant 0 : i32
    %c0_i32_0 = arith.constant 0 : i32
    return %arg0, %c0_i32, %arg1 : i32, i32, i32
  }
}

</mosaic_0001>

<bundles_post_ra>
// kernel: tpu_custom_call.1
= control target key start
LH: loop header
LB: loop body
LE: loop exit
PB: predicated region body
PF: predicated region fallthrough
CT: control target
= control target key end

     0   :  { %8 = vsyncpa [#allocation3], 0  ;;  %s722_s0 = inlined_call_operand.vmem [shape: f32[2,4,256], index: 0, kind: input, shape index: {}]   ;;  %s723_s1 = inlined_call_operand.vmem [shape: f32[8,4], index: 1, kind: input, shape index: {}]   ;;  %s724_s2 = inlined_call_operand.vmem [shape: f32[8,1], index: 2, kind: input, shape index: {}]   ;;  %s725_s3 = inlined_call_operand.hbm [shape: f32[2,8,256], index: 3, kind: output, shape index: {}]  }
   0x1   :  { %10 = vsyncpa [#allocation3 + $0x1], 0  ;;  %s604_s12 = smov 0   ;;  %s606_s13 = smov 0  }
   0x2   :  { %s608_s14 = smov 0   ;;  %s610_s15 = smov 0  }
   0x3   :  { %s612_s16 = smov 0   ;;  %s614_s17 = smov 0  }
   0x4 LB: > { %s417_s18 = sadd.s32 4294967295, %s577_s17   ;;  %s418_s19 = sadd.s32 4294967294, %s577_s17   ;;  %s577_s17 = sphi %s614_s17, %s16_s17   ;;  %s573_s16 = sphi %s612_s16, %s732_s16   ;;  %s569_s15 = sphi %s610_s15, %s731_s15   ;;  %s565_s14 = sphi %s608_s14, %s730_s14   ;;  %s561_s13 = sphi %s606_s13, %s729_s13   ;;  %s557_s12 = sphi %s604_s12, %s728_s12  }
   0x5   : > { %s28_s20 = sadd.s32 1, %s573_s16  ;;  %s107_s21 = sadd.s32 1, %s565_s14 }
   0x6   : > { %p30_p0 = scmp.ge.s32.totalorder %s28_s20, 2  ;;  %p117_p1 = scmp.ne.s32.totalorder %s565_s14, %s561_s13 }
   0x7   : > { %p118_p2 = scmp.eq.s32.totalorder %s417_s18, 1  ;;  %p123_p3 = scmp.ne.s32.totalorder %s561_s13, %s557_s12 }
   0x8   : > { %s734_s20 = smov (%p30_p0, %s28_s20), 0  ;;  %p124_p5 = scmp.eq.s32.totalorder %s418_s19, 1 }
   0x9   : > { %p644_p4 = por %p118_p2, %p117_p1  ;;  %s102_s23 = ssub.s32 %s573_s16, %s734_s20 }
   0xa   : > { %p421_p6 = scmp.ge.s32.totalorder %s577_s17, 1  ;;  %p105_p7 = scmp.eq.s32.totalorder %s102_s23, 0 }
   0xb   : > { %p651_p8 = por %p124_p5, %p123_p3  ;;  %p161_p9 = scmp.lt.s32.totalorder %s577_s17, 3 }
   0xc   : > { %s657_s25 = scalar_select %p105_p7, %s565_s14, %s107_s21  }
   0xd   : > { %p162_p10 = pnand %p421_p6, %p161_p9 }
   0xe   : > { %v201_v0 = vld [vmem:[%s723_s1] sm:$0xff] (!%p162_p10)  ;;  %v579_v1 = vmov (!%p162_p10), 0   ;;  %v580_v2 = vmov (!%p162_p10), 1   ;;  %v581_v4 = vmov (!%p162_p10), 2   ;;  %v582_v5 = vmov (!%p162_p10), 3   ;;  %p190_p11 = scmp.lt.s32.totalorder (!%p162_p10), %s569_s15, 1 }
   0xf   : > { %165 = sbr.rel (%p162_p10) target bundleno = 189 (0xbd), region = 32  ;;  %491 = vset.pattern.permute.xlu0 (!%p162_p10), %v579_v1  ;;  %492 = vset.pattern.permute.xlu1 (!%p162_p10), %v580_v2  ;;  %v202_v3 = vld [vmem:[%s724_s2] sm:$0xff] (!%p162_p10)  ;;  %v209_v6 = vlaneseq (!%p162_p10)  ;;  %s186_s8 = sand.u32 (!%p162_p10), 1, %s561_s13  }
  0x10   : > { %205 = vperm.xlu0 (!%p162_p10), %491, %v201_v0   ;;  %237 = vperm.xlu1 (!%p162_p10), %492, %v201_v0   ;;  %s422_s9 = sshll.u32 (!%p162_p10), %s186_s8, 4  ;;  %s431_s10 = sshll.u32 (!%p162_p10), %s569_s15, 8 }
  0x11   : > { %v210_v7 = vshrl.u32 (!%p162_p10), %v209_v6, 7  ;;  %s188_s11 = scalar_lea.vmem (!%p162_p10), [#allocation2], %s422_s9  ;;  %s675_s23 = scalar_lea.hbm (!%p162_p10), %s725_s3, %s431_s10 }
  0x12   : > { %s341_s18 = sshll.u32 (!%p162_p10), %s188_s11, 4  ;;  %s325_s26 = scalar_lea.sflag (!%p162_p10), [#allocation3], %s186_s8  ;;  %s677_s18 = int_to_ptr.vmem [resolvable:$true] %s341_s18 }
  0x13   : > { %v211_v8 = vsub.s32 (!%p162_p10), 0, %v210_v7  ;;  %v215_v9 = vsub.s32 (!%p162_p10), 4, %v210_v7  ;;  %v242_v11 = vsub.s32 (!%p162_p10), 1, %v210_v7  ;;  %v246_v12 = vsub.s32 (!%p162_p10), 5, %v210_v7  ;;  %s499_s27 = scalar_lea.vmem (!%p162_p10), %s677_s18, 256 }
  0x14   : > { %231 = vperm.xlu0 (!%p162_p10), %491, %v202_v3   ;;  %493 = vset.pattern.permute.xlu1 (!%p162_p10), %v581_v4  ;;  %v268_v13 = vsub.s32 (!%p162_p10), 2, %v210_v7  ;;  %v272_v14 = vsub.s32 (!%p162_p10), 6, %v210_v7  ;;  %v294_v21 = vsub.s32 (!%p162_p10), 3, %v210_v7  ;;  %v298_v22 = vsub.s32 (!%p162_p10), 7, %v210_v7  ;;  %p500_p12 = scmp.ne.s32.totalorder (!%p162_p10), %s677_s18, %s499_s27 }
  0x15   : > { %263 = vperm.xlu1 (!%p162_p10), %493, %v201_v0  }
  0x16   : > { %s191_s30 = scalar_select %p190_p11, %s569_s15, 1 }
  0x17   : > { %p501_p13 = pnand %p500_p12, %p644_p4  ;;  %s583_s15 = smov [#allocation2]  }
  0x18   : > { %494 = vset.pattern.permute.xlu0 %v582_v5  ;;  %s430_s4 = sshll.u32 %s191_s30, 3  ;;  %s503_s28 = sshll.u32 %s583_s15, 4  ;;  %s504_s28 = int_to_ptr.vmem [resolvable:$false] %s503_s28 }
  0x19   : > { %289 = vperm.xlu0 %494, %v201_v0   ;;  %s197_s7 = scalar_lea.vmem %s722_s0, %s430_s4  ;;  %p502_p0 = pneg %p501_p13 }
  0x1a   : > { %v200_v10 = vld [vmem:[%s197_s7] sm:$0xff]  ;;  %s505_s29 = scalar_lea.vmem %s504_s28, 512  ;;  %p506_p1 = scmp.lt.s32.totalorder %s677_s18, %s504_s28 }
  0x1b   : > { %v212_v15 = vrot.slane %v200_v10, %v211_v8  ;;  %v216_v16 = vrot.slane %v200_v10, %v215_v9  ;;  %v243_v17 = vrot.slane %v200_v10, %v242_v11  ;;  %v247_v18 = vrot.slane %v200_v10, %v246_v12  ;;  %p507_p2 = scmp.lt.s32.totalorder %s505_s29, %s499_s27 }
  0x1c   : > { %v269_v19 = vrot.slane %v200_v10, %v268_v13  ;;  %v273_v20 = vrot.slane %v200_v10, %v272_v14  ;;  %v295_v31 = vrot.slane %v200_v10, %v294_v21  ;;  %v299_v32 = vrot.slane %v200_v10, %v298_v22 }
  0x1d   : > { %v222_v23 = vrot.slane %v212_v15, %v211_v8  ;;  %v226_v24 = vrot.slane %v216_v16, %v211_v8  ;;  %v253_v27 = vrot.slane %v243_v17, %v242_v11  ;;  %v257_v28 = vrot.slane %v247_v18, %v242_v11  ;;  %p508_p3 = por %p507_p2, %p506_p1 }
  0x1e   : > { %v279_v29 = vrot.slane %v269_v19, %v268_v13  ;;  %v283_v30 = vrot.slane %v273_v20, %v268_v13  ;;  %v305_v43 = vrot.slane %v295_v31, %v294_v21  ;;  %v309_v44 = vrot.slane %v299_v32, %v294_v21 }
  0x1f   : > { %p509_p5 = pnand %p508_p3, %p502_p0 }
  0x8f   : > { %v206_v25 = vpop.permute.xlu0 %205  ;;  %v238_v26 = vpop.permute.xlu1 %237 }
  0x90   : > { %v227_v33 = vmul.f32 %v222_v23, %v206_v25  ;;  %v228_v34 = vmul.f32 %v226_v24, %v206_v25  ;;  %v258_v36 = vmul.f32 %v253_v27, %v238_v26  ;;  %v259_v37 = vmul.f32 %v257_v28, %v238_v26 }
  0x93   : > { %v232_v35 = vpop.permute.xlu0 %231 }
  0x94   : > { %v234_v38 = vadd.f32 %v232_v35, %v227_v33  ;;  %v235_v39 = vadd.f32 %v232_v35, %v228_v34  ;;  %v264_v40 = vpop.permute.xlu1 %263 }
  0x95   : > { %v284_v41 = vmul.f32 %v279_v29, %v264_v40  ;;  %v285_v42 = vmul.f32 %v283_v30, %v264_v40 }
  0x96   : > { %v260_v45 = vadd.f32 %v258_v36, %v234_v38  ;;  %v261_v46 = vadd.f32 %v259_v37, %v235_v39 }
  0x98   : > { %v286_v47 = vadd.f32 %v284_v41, %v260_v45  ;;  %v287_v48 = vadd.f32 %v285_v42, %v261_v46  ;;  %v290_v49 = vpop.permute.xlu0 %289 }
  0x99   : > { %v310_v50 = vmul.f32 %v305_v43, %v290_v49  ;;  %v311_v51 = vmul.f32 %v309_v44, %v290_v49 }
  0x9b   : > { %v312_v52 = vadd.f32 %v310_v50, %v286_v47  ;;  %v313_v53 = vadd.f32 %v311_v51, %v287_v48 }
  0x9d   : > { %v314_v54 = vmul.f32 0.5, %v312_v52  ;;  %v315_v55 = vmul.f32 0.5, %v313_v53 }
  0x9f   : > { %495 = vtanh.f32 %v314_v54 }
  0xa0   : > { %497 = vtanh.f32 %v315_v55 }
  0xa9   : > { %v496_v56 = vpop.eup %495 }
  0xaa   : > { %v498_v57 = vpop.eup %497  ;;  %v318_v58 = vmul.f32 0.5, %v496_v56 }
  0xab   : > { %v319_v59 = vmul.f32 0.5, %v498_v57 }
  0xac   : > { %v320_v60 = vadd.f32 0.5, %v318_v58 }
  0xad   : > { %v321_v61 = vadd.f32 0.5, %v319_v59 }
  0xae   : > { %322 = vst [vmem:[%s188_s11] sm:$0xff] %v320_v60 }
  0xaf   : > { %323 = vst [vmem:[%s188_s11 + $0x8] sm:$0xff] %v321_v61 }
  0xb0   : > { %512 = shalt.err (!%p509_p5)
}
  0xb1   : > { %s513_s30 = scalar_lea.hbm %s675_s23, 256  ;;  %s517_s6 = scalar_lea.hbm %s725_s3, 512 }
  0xb2   : > { %p514_p6 = scmp.ne.s32.totalorder %s675_s23, %s513_s30  ;;  %p518_p10 = scmp.lt.u32.totalorder %s675_s23, %s725_s3 }
  0xb3   : > { %p519_p11 = scmp.lt.u32.totalorder %s517_s6, %s513_s30  ;;  %p521_p13 = scmp.lt.u32.totalorder %s513_s30, %s675_s23 }
  0xb4   : > { %p515_p7 = pnand %p514_p6, %p644_p4 }
  0xb5   : > { %p520_p12 = por %p519_p11, %p518_p10 }
  0xb6   : > { %p516_p9 = pneg %p515_p7 }
  0xb7   : > { %p522_p0 = por %p521_p13, %p520_p12 }
  0xb9   : > { %p523_p1 = pnand %p522_p0, %p516_p9 }
  0xbb   : > { %526 = shalt.err (!%p523_p1)
}
  0xbc   : > { %432 = dma.vmem_to_hbm [thread:$0]  (%p644_p4), %s677_s18, 256, %s675_s23, %s325_s26  }
  0xbd PF: > { %p438_p2 = scmp.ge.s32.totalorder %s577_s17, 2  ;;  %s353_s9 = sand.u32 1, %s557_s12  }
  0xbe   : > { %s354_s10 = scalar_lea.sflag [#allocation3], %s353_s9 }
  0xbf   : > { %p435_p3 = pnand %p438_p2, %p651_p8 }
  0xc1   : > { %552 = dma.done.wait (!%p435_p3), %s354_s10, 256  }
  0xc2   : > { %554 = vsyncadd (!%p435_p3), %s354_s10, 4294967040  ;;  %s16_s17 = sadd.s32 1, %s577_s17   ;;  %s728_s12 = smov %s561_s13 }
  0xc3   : > { %p13_p5 = scmp.ge.s32.totalorder %s16_s17, 4   ;;  %s729_s13 = smov %s565_s14 }
  0xc4   : > { %s730_s14 = smov %s657_s25  ;;  %s731_s15 = smov %s573_s16 }
  0xc5   : > { %s732_s16 = smov %s734_s20  ;;  %15 = sbr.rel (!%p13_p5) target bundleno = 4 (0x4), region = 67 }
  0xcc   :  { %359 = vsyncpa [#allocation3], 1 }
  0xcd   :  { %361 = vsyncpa [#allocation3 + $0x1], 1 }

</bundles_post_ra>
